<compile_context>
chip_gen: v7x
topology: tpu7x:2x2x1
jax: 0.10.0
libtpu: 0.0.40
codegen_flags: <defaults>
</compile_context>

<pallas_src>
import math
import functools

import jax
import jax.numpy as jnp
from jax import lax
from jax.experimental import pallas as pl
from jax.experimental.pallas import tpu as pltpu


def _round_up(n, m):
    return ((n + m - 1) // m) * m


def _arcface_logits_kernel(x_ref, wt_ref, label_ref, out_ref, *,
                           scale, cos_m, sin_m, th, mm,
                           easy_margin, ls_eps, out_features, c_tile):
    """One C-tile of the ArcFace head: cosine matmul + margin + one-hot blend."""
    j = pl.program_id(0)

    x = x_ref[...].astype(jnp.float32)            # (B, Dp)  f32 activations
    wt = wt_ref[...].astype(jnp.float32)          # (Dp, TC) bf16 stream -> f32
    label = label_ref[...]                        # (B, 1)   int32

    eps = 1e-12
    # F.normalize(v) == v / max(||v||, eps) == v * rsqrt(max(sum v^2, eps^2))
    # rsqrt lands on the EUP slot instead of a VALU divide chain.
    xn = x * lax.rsqrt(jnp.maximum(jnp.sum(x * x, axis=-1, keepdims=True), eps * eps))
    wn = wt * lax.rsqrt(jnp.maximum(jnp.sum(wt * wt, axis=0, keepdims=True), eps * eps))

    # MXU matmul: bf16 operands, f32 accumulation.  (B, Dp) @ (Dp, TC) -> (B, TC)
    cosine = jnp.dot(xn.astype(jnp.bfloat16), wn.astype(jnp.bfloat16),
                     preferred_element_type=jnp.float32)

    # Arc-margin (f32 elementwise).  Clamp guards sqrt against tiny overshoots.
    sine = jnp.sqrt(jnp.clip(1.0 - cosine * cosine, 0.0, 1.0))
    phi = cosine * cos_m - sine * sin_m
    if easy_margin:
        phi = jnp.where(cosine > 0.0, phi, cosine)
    else:
        phi = jnp.where(cosine > th, phi, cosine - mm)

    B, TC = cosine.shape
    col = j * c_tile + lax.broadcasted_iota(jnp.int32, (B, TC), 1)
    is_target = col == label                      # (B, TC) bool mask

    if ls_eps > 0.0:
        one_hot = (1.0 - ls_eps) * is_target.astype(jnp.float32) + ls_eps / out_features
        output = cosine + one_hot * (phi - cosine)
    else:
        # Fused blend: no f32 one-hot materialization at all.
        output = jnp.where(is_target, phi, cosine)

    out_ref[...] = (output * scale).astype(out_ref.dtype)


def _ce_loss_kernel(label_ref, logits_ref, loss_ref, m_sc, l_sc, t_sc, *,
                    num_classes, c_tile):
    """Streaming mean cross-entropy: online logsumexp over C tiles."""
    j = pl.program_id(0)

    @pl.when(j == 0)
    def _():
        m_sc[...] = jnp.full_like(m_sc, -1e30)
        l_sc[...] = jnp.zeros_like(l_sc)
        t_sc[...] = jnp.zeros_like(t_sc)

    z = logits_ref[...]                           # (B, TC) f32
    label = label_ref[...]                        # (B, 1) int32
    B, TC = z.shape
    col = j * c_tile + lax.broadcasted_iota(jnp.int32, (B, TC), 1)

    # Mask out zero-padded classes so they don't contribute to the softmax.
    zv = jnp.where(col < num_classes, z, -1e30)

    m_new = jnp.maximum(m_sc[...], jnp.max(zv, axis=-1, keepdims=True))
    alpha = jnp.exp(m_sc[...] - m_new)
    l_sc[...] = alpha * l_sc[...] + jnp.sum(jnp.exp(zv - m_new), axis=-1, keepdims=True)
    m_sc[...] = m_new
    # Target logit: only the tile containing label[i] contributes.
    t_sc[...] = t_sc[...] + jnp.sum(jnp.where(col == label, z, 0.0),
                                    axis=-1, keepdims=True)

    @pl.when(j == pl.num_programs(0) - 1)
    def _():
        lse = m_sc[...] + jnp.log(l_sc[...])      # (B, 1)
        loss_ref[0, 0] = jnp.mean(lse - t_sc[...])


def arc_margin_product(x, weight, label, *, scale=30.0, margin=0.5,
                       easy_margin=False, ls_eps=0.0, c_tile=1024):
    B, D = x.shape
    C, D2 = weight.shape
    assert D == D2

    d_pad = _round_up(D, 128)
    c_tile = min(c_tile, _round_up(C, 128))       # lane-dense tile, <= padded C
    c_pad = _round_up(C, c_tile)
    num_tiles = c_pad // c_tile

    x_p = jnp.pad(x.astype(jnp.float32), ((0, 0), (0, d_pad - D)))
    w_p = jnp.pad(weight.astype(jnp.float32), ((0, c_pad - C), (0, d_pad - D)))
    # Pre-transposed (D, C) bf16 weight: MXU-ready tiles, half the HBM bytes.
    wt = w_p.T.astype(jnp.bfloat16)               # (d_pad, c_pad)
    label2d = label.astype(jnp.int32).reshape(B, 1)

    logits_kernel = functools.partial(
        _arcface_logits_kernel,
        scale=float(scale),
        cos_m=math.cos(margin),
        sin_m=math.sin(margin),
        th=math.cos(math.pi - margin),
        mm=math.sin(math.pi - margin) * margin,
        easy_margin=bool(easy_margin),
        ls_eps=float(ls_eps),
        out_features=C,
        c_tile=c_tile,
    )

    logits_pad = pl.pallas_call(
        logits_kernel,
        grid=(num_tiles,),
        in_specs=[
            pl.BlockSpec((B, d_pad), lambda j: (0, 0)),
            pl.BlockSpec((d_pad, c_tile), lambda j: (0, j)),
            pl.BlockSpec((B, 1), lambda j: (0, 0)),
        ],
        out_specs=pl.BlockSpec((B, c_tile), lambda j: (0, j)),
        out_shape=jax.ShapeDtypeStruct((B, c_pad), jnp.float32),
        compiler_params=pltpu.CompilerParams(
            dimension_semantics=("parallel",),        # C tiles shard across TCs (v7x)
            vmem_limit_bytes=48 * 1024 * 1024),       # fits v7x 64 MiB with headroom
    )(x_p, wt, label2d)

    ce_kernel = functools.partial(_ce_loss_kernel, num_classes=C, c_tile=c_tile)
    loss = pl.pallas_call(
        ce_kernel,
        grid=(num_tiles,),
        in_specs=[
            pl.BlockSpec((B, 1), lambda j: (0, 0)),
            pl.BlockSpec((B, c_tile), lambda j: (0, j)),
        ],
        out_specs=pl.BlockSpec((1, 1), lambda j: (0, 0), memory_space=pltpu.SMEM),
        out_shape=jax.ShapeDtypeStruct((1, 1), jnp.float32),
        scratch_shapes=[pltpu.VMEM((B, 1), jnp.float32),   # running max
                        pltpu.VMEM((B, 1), jnp.float32),   # running sum-exp
                        pltpu.VMEM((B, 1), jnp.float32)],  # target logit
        compiler_params=pltpu.CompilerParams(
            dimension_semantics=("arbitrary",),       # reduction over C tiles
            vmem_limit_bytes=48 * 1024 * 1024),
    )(label2d, logits_pad)

    return logits_pad[:, :C], loss[0, 0]


def _reference(x, weight, label, *, scale=30.0, margin=0.5,
               easy_margin=False, ls_eps=0.0):
    # Mirrors the PyTorch forward, with the cosine matmul done at the kernel's
    # MXU precision (bf16 operands, f32 accumulation) so margin thresholds agree.
    eps = 1e-12
    w32 = weight.astype(jnp.bfloat16).astype(jnp.float32)  # kernel streams W as bf16
    xn = x * lax.rsqrt(jnp.maximum(jnp.sum(x * x, axis=1, keepdims=True), eps * eps))
    wn = w32 * lax.rsqrt(jnp.maximum(jnp.sum(w32 * w32, axis=1, keepdims=True), eps * eps))
    cosine = jnp.dot(xn.astype(jnp.bfloat16), wn.astype(jnp.bfloat16).T,
                     preferred_element_type=jnp.float32)
    sine = jnp.sqrt(jnp.clip(1.0 - cosine ** 2, 0.0, 1.0))
    cos_m, sin_m = math.cos(margin), math.sin(margin)
    th = math.cos(math.pi - margin)
    mm = math.sin(math.pi - margin) * margin
    phi = cosine * cos_m - sine * sin_m
    phi = (jnp.where(cosine > 0, phi, cosine) if easy_margin
           else jnp.where(cosine > th, phi, cosine - mm))
    one_hot = jax.nn.one_hot(label, weight.shape[0], dtype=jnp.float32)
    if ls_eps > 0:
        one_hot = (1 - ls_eps) * one_hot + ls_eps / weight.shape[0]
    out = (one_hot * phi + (1.0 - one_hot) * cosine) * scale
    logp = jax.nn.log_softmax(out, axis=-1)
    loss = -jnp.mean(jnp.take_along_axis(logp, label[:, None], axis=1))
    return out, loss


if __name__ == "__main__":
    B, in_features, out_features = 8, 64, 200

    key = jax.random.PRNGKey(0)
    kx, kw, kl = jax.random.split(key, 3)

    x = jax.random.normal(kx, (B, in_features), dtype=jnp.float32)
    # Xavier-uniform init of weight (out_features, in_features), gain=1
    bound = math.sqrt(6.0 / (in_features + out_features))
    weight = jax.random.uniform(kw, (out_features, in_features),
                                dtype=jnp.float32, minval=-bound, maxval=bound)
    label = jax.random.randint(kl, (B,), 0, out_features, dtype=jnp.int32)

    # c_tile=128 so the small demo exercises multi-tile W streaming,
    # class padding/masking, and the online-logsumexp CE accumulation.
    logits, loss = arc_margin_product(x, weight, label,
                                      scale=30.0, margin=0.5,
                                      easy_margin=False, ls_eps=0.0,
                                      c_tile=128)
    jax.block_until_ready((logits, loss))

    ref_logits, ref_loss = _reference(x, weight, label,
                                      scale=30.0, margin=0.5,
                                      easy_margin=False, ls_eps=0.0)
    assert logits.shape == (B, out_features)
    assert jnp.allclose(logits, ref_logits, atol=5e-3, rtol=5e-3), "logits mismatch"
    assert jnp.allclose(loss, ref_loss, atol=5e-3, rtol=5e-3), "loss mismatch"

    print("KERNEL_OK")
</pallas_src>

<mosaic_0001>
module attributes {stable_mosaic.version = 11 : i64} {
  func.func @_arcface_logits_kernel(%arg0: i32, %arg1: memref<8x128xf32, #tpu.memory_space<vmem>>, %arg2: memref<128x128xbf16, #tpu.memory_space<vmem>>, %arg3: memref<8x1xi32, #tpu.memory_space<vmem>>, %arg4: memref<8x128xf32, #tpu.memory_space<vmem>>) attributes {dimension_semantics = [#tpu.dimension_semantics<parallel>], iteration_bounds = array<i64: 2>, scalar_prefetch = 0 : i64, scratch_operands = 0 : i64, tpu.core_type = #tpu.core_type<tc>, window_params = [{pipeline_mode = #tpu.pipeline_mode<synchronous>, transform_indices = @transform_0, window_bounds = array<i64: 8, 128>}, {transform_indices = @transform_1, window_bounds = array<i64: 128, 128>}, {pipeline_mode = #tpu.pipeline_mode<synchronous>, transform_indices = @transform_2, window_bounds = array<i64: 8, 1>}, {transform_indices = @transform_3, window_bounds = array<i64: 8, 128>}]} {
    %c0 = arith.constant 0 : index
    %c0_0 = arith.constant 0 : index
    %0 = vector.load %arg1[%c0, %c0_0] : memref<8x128xf32, #tpu.memory_space<vmem>>, vector<8x128xf32>
    %c0_1 = arith.constant 0 : index
    %c0_2 = arith.constant 0 : index
    %1 = vector.load %arg2[%c0_1, %c0_2] : memref<128x128xbf16, #tpu.memory_space<vmem>>, vector<128x128xbf16>
    %2 = arith.extf %1 : vector<128x128xbf16> to vector<128x128xf32>
    %c0_3 = arith.constant 0 : index
    %c0_4 = arith.constant 0 : index
    %3 = vector.load %arg3[%c0_3, %c0_4] : memref<8x1xi32, #tpu.memory_space<vmem>>, vector<8x1xi32>
    %4 = arith.mulf %0, %0 : vector<8x128xf32>
    %cst = arith.constant dense<0.000000e+00> : vector<8xf32>
    %5 = vector.multi_reduction <add>, %4, %cst [1] : vector<8x128xf32> to vector<8xf32>
    %6 = vector.shape_cast %5 : vector<8xf32> to vector<8x1xf32>
    %cst_5 = arith.constant 1.000000e-24 : f32
    %7 = vector.broadcast %cst_5 : f32 to vector<8x1xf32>
    %8 = arith.maximumf %6, %7 : vector<8x1xf32>
    %9 = math.rsqrt %8 : vector<8x1xf32>
    %10 = vector.broadcast %9 : vector<8x1xf32> to vector<8x128xf32>
    %11 = arith.mulf %0, %10 : vector<8x128xf32>
    %12 = arith.mulf %2, %2 : vector<128x128xf32>
    %cst_6 = arith.constant dense<0.000000e+00> : vector<128xf32>
    %13 = vector.multi_reduction <add>, %12, %cst_6 [0] : vector<128x128xf32> to vector<128xf32>
    %14 = vector.shape_cast %13 : vector<128xf32> to vector<1x128xf32>
    %cst_7 = arith.constant 1.000000e-24 : f32
    %15 = vector.broadcast %cst_7 : f32 to vector<1x128xf32>
    %16 = arith.maximumf %14, %15 : vector<1x128xf32>
    %17 = math.rsqrt %16 : vector<1x128xf32>
    %18 = vector.broadcast %17 : vector<1x128xf32> to vector<128x128xf32>
    %19 = arith.mulf %2, %18 : vector<128x128xf32>
    %20 = arith.truncf %11 : vector<8x128xf32> to vector<8x128xbf16>
    %21 = arith.truncf %19 : vector<128x128xf32> to vector<128x128xbf16>
    %cst_8 = arith.constant dense<0.000000e+00> : vector<8x128xf32>
    %22 = tpu.matmul %20, %21, %cst_8 {dimension_numbers = #tpu.dot_dimension_numbers<[1], [0], [0], [1], [0, 0, 1, 1], [], []>} : vector<8x128xbf16>, vector<128x128xbf16>, vector<8x128xf32> -> vector<8x128xf32>
    %23 = arith.mulf %22, %22 : vector<8x128xf32>
    %cst_9 = arith.constant 1.000000e+00 : f32
    %24 = vector.broadcast %cst_9 : f32 to vector<8x128xf32>
    %25 = arith.subf %24, %23 : vector<8x128xf32>
    %cst_10 = arith.constant 0.000000e+00 : f32
    %cst_11 = arith.constant 1.000000e+00 : f32
    %26 = vector.broadcast %cst_10 : f32 to vector<8x128xf32>
    %27 = arith.maximumf %26, %25 : vector<8x128xf32>
    %28 = vector.broadcast %cst_11 : f32 to vector<8x128xf32>
    %29 = arith.minimumf %28, %27 : vector<8x128xf32>
    %30 = math.sqrt %29 : vector<8x128xf32>
    %cst_12 = arith.constant 0.87758255 : f32
    %31 = vector.broadcast %cst_12 : f32 to vector<8x128xf32>
    %32 = arith.mulf %22, %31 : vector<8x128xf32>
    %cst_13 = arith.constant 0.47942555 : f32
    %33 = vector.broadcast %cst_13 : f32 to vector<8x128xf32>
    %34 = arith.mulf %30, %33 : vector<8x128xf32>
    %35 = arith.subf %32, %34 : vector<8x128xf32>
    %cst_14 = arith.constant -0.87758255 : f32
    %36 = vector.broadcast %cst_14 : f32 to vector<8x128xf32>
    %37 = arith.cmpf ogt, %22, %36 : vector<8x128xf32>
    %cst_15 = arith.constant 0.239712775 : f32
    %38 = vector.broadcast %cst_15 : f32 to vector<8x128xf32>
    %39 = arith.subf %22, %38 : vector<8x128xf32>
    %40 = arith.select %37, %35, %39 : vector<8x128xi1>, vector<8x128xf32>
    %c128_i32 = arith.constant 128 : i32
    %41 = arith.muli %arg0, %c128_i32 : i32
    %42 = tpu.iota {dimensions = array<i32: 1>} : vector<8x128xi32>
    %43 = vector.broadcast %41 : i32 to vector<8x128xi32>
    %44 = arith.addi %43, %42 : vector<8x128xi32>
    %45 = vector.broadcast %3 : vector<8x1xi32> to vector<8x128xi32>
    %46 = arith.cmpi eq, %44, %45 : vector<8x128xi32>
    %47 = arith.select %46, %40, %22 : vector<8x128xi1>, vector<8x128xf32>
    %cst_16 = arith.constant 3.000000e+01 : f32
    %48 = vector.broadcast %cst_16 : f32 to vector<8x128xf32>
    %49 = arith.mulf %47, %48 : vector<8x128xf32>
    %c0_17 = arith.constant 0 : index
    %c0_18 = arith.constant 0 : index
    %50 = vector.load %arg4[%c0_17, %c0_18] : memref<8x128xf32, #tpu.memory_space<vmem>>, vector<8x128xf32>
    tpu.vector_store %arg4[%c0_17, %c0_18], %49 {strides = array<i32>} : memref<8x128xf32, #tpu.memory_space<vmem>>, vector<8x128xf32>,
    return
  }
  func.func @transform_0(%arg0: i32) -> (i32, i32) {
    %c0_i32 = arith.constant 0 : i32
    %c0_i32_0 = arith.constant 0 : i32
    %c0_i32_1 = arith.constant 0 : i32
    return %c0_i32, %c0_i32_0 : i32, i32
  }
  func.func @transform_1(%arg0: i32) -> (i32, i32) {
    %c0_i32 = arith.constant 0 : i32
    %c0_i32_0 = arith.constant 0 : i32
    return %c0_i32, %arg0 : i32, i32
  }
  func.func @transform_2(%arg0: i32) -> (i32, i32) {
    %c0_i32 = arith.constant 0 : i32
    %c0_i32_0 = arith.constant 0 : i32
    %c0_i32_1 = arith.constant 0 : i32
    return %c0_i32, %c0_i32_0 : i32, i32
  }
  func.func @transform_3(%arg0: i32) -> (i32, i32) {
    %c0_i32 = arith.constant 0 : i32
    %c0_i32_0 = arith.constant 0 : i32
    return %c0_i32, %arg0 : i32, i32
  }
}

</mosaic_0001>

<bundles_post_ra>
// kernel: tpu_custom_call.1
= control target key start
LH: loop header
LB: loop body
LE: loop exit
PB: predicated region body
PF: predicated region fallthrough
CT: control target
= control target key end

     0   :  { %8 = vsyncpa [#allocation3], 0  ;;  %s956_s0 = inlined_call_operand.vmem [shape: f32[8,128], index: 0, kind: input, shape index: {}]   ;;  %s957_s1 = inlined_call_operand.hbm [shape: bf16[128,256], index: 1, kind: input, shape index: {}]   ;;  %s958_s2 = inlined_call_operand.vmem [shape: s32[8,1], index: 2, kind: input, shape index: {}]   ;;  %s959_s3 = inlined_call_operand.hbm [shape: f32[8,256], index: 3, kind: output, shape index: {}]  }
   0x1   :  { %10 = vsyncpa [#allocation3 + $0x1], 0 }
   0x2   :  { %11 = vsyncpa [#allocation4], 0 }
   0x3   :  { %13 = vsyncpa [#allocation4 + $0x1], 0  ;;  %s713_s12 = smov 0   ;;  %s715_s13 = smov 0  }
   0x4   :  { %s717_s14 = smov 0   ;;  %s719_s15 = smov 0  }
   0x5 LB: > { %s734_s16 = sadd.s32 4294967295, %s683_s15   ;;  %s446_s17 = sadd.s32 4294967294, %s683_s15   ;;  %s683_s15 = sphi %s719_s15, %s973_s15   ;;  %s679_s14 = sphi %s717_s14, %s972_s14   ;;  %s675_s13 = sphi %s715_s13, %s971_s13   ;;  %s671_s12 = sphi %s713_s12, %s970_s12  }
   0x6   : > { %s738_s18 = sadd.s32 1, %s683_s15   ;;  %s47_s19 = sadd.s32 1, %s679_s14 }
   0x7   : > { %s44_s20 = ssub.s32 %s683_s15, %s738_s18  ;;  %p54_p0 = scmp.ne.s32.totalorder %s679_s14, %s675_s13 }
   0x8   : > { %p45_p1 = scmp.eq.s32.totalorder %s44_s20, 0  ;;  %p55_p2 = scmp.eq.s32.totalorder %s683_s15, 0 }
   0x9   : > { %p60_p3 = scmp.ne.s32.totalorder %s675_s13, %s671_s12  ;;  %p61_p4 = scmp.eq.s32.totalorder %s734_s16, 0 }
   0xa   : > { %s750_s21 = scalar_select %p45_p1, %s679_s14, %s47_s19  }
   0xb   : > { %p752_p5 = por %p55_p2, %p54_p0  ;;  %p756_p6 = por %p61_p4, %p60_p3 }
   0xc   : > { %p105_p7 = scmp.eq.s32.totalorder %s734_s16, 1  ;;  %p111_p8 = scmp.eq.s32.totalorder %s446_s17, 1 }
   0xd   : > { %p540_p10 = scmp.lt.s32.totalorder %s683_s15, 2  ;;  %s137_s26 = sand.u32 1, %s679_s14  }
   0xe   : > { %p763_p11 = por %p105_p7, %p54_p0  ;;  %p767_p12 = por %p111_p8, %p60_p3 }
   0xf   : > { %s450_s27 = sshll.u32 %s683_s15, 6  ;;  %s449_s28 = sshll.u32 %s137_s26, 6 }
  0x10   : > { %s963_s24 = scalar_select %p763_p11, 1, 0 }
  0x11   : > { %s964_s25 = scalar_select %p767_p12, 1, 0 }
  0x12   : > { %s776_s4 = scalar_lea.hbm %s957_s1, %s450_s27  ;;  %s141_s5 = scalar_lea.vmem [#allocation2], %s449_s28 }
  0x13   : > { %s147_s6 = sshll.u32 %s141_s5, 4  ;;  %p780_p13 = pnand %p540_p10, %p752_p5  ;;  %s784_s6 = int_to_ptr.vmem [resolvable:$true] %s147_s6 }
  0x14   : > { %s787_s8 = scalar_lea.sflag [#allocation3], %s137_s26  ;;  %s587_s9 = scalar_lea.hbm %s776_s4, 1024 }
  0x15   : > { %p588_p1 = scmp.ne.s32.totalorder %s776_s4, %s587_s9  ;;  %p589_p2 = pneg %p780_p13 }
  0x16   : > { %s592_s17 = scalar_lea.hbm %s957_s1, 2048  ;;  %p593_p5 = scmp.lt.u32.totalorder %s776_s4, %s957_s1 }
  0x17   : > { %p590_p3 = pnand %p589_p2, %p588_p1  ;;  %p594_p7 = scmp.lt.u32.totalorder %s592_s17, %s587_s9 }
  0x18   : > { %p596_p10 = scmp.lt.u32.totalorder %s587_s9, %s776_s4 }
  0x19   : > { %p591_p4 = pneg %p590_p3  ;;  %p595_p8 = por %p594_p7, %p593_p5 }
  0x1b   : > { %p597_p9 = por %p596_p10, %p595_p8 }
  0x1d   : > { %p598_p0 = pnand %p597_p9, %p591_p4 }
  0x1f   : > { %601 = shalt.err (!%p598_p0)
}
  0x20   : > { %s602_s22 = scalar_lea.vmem %s784_s6, 1024  ;;  %s685_s26 = smov [#allocation2]  }
  0x21   : > { %p603_p1 = scmp.ne.s32.totalorder %s784_s6, %s602_s22  ;;  %s607_s27 = sshll.u32 %s685_s26, 4  ;;  %s608_s27 = int_to_ptr.vmem [resolvable:$false] %s607_s27 }
  0x22   : > { %s609_s28 = scalar_lea.vmem %s608_s27, 2048  ;;  %p610_p11 = scmp.lt.s32.totalorder %s784_s6, %s608_s27 }
  0x23   : > { %p605_p3 = pnand %p603_p1, %p589_p2  ;;  %p611_p5 = scmp.lt.s32.totalorder %s609_s28, %s602_s22 }
  0x25   : > { %p606_p12 = pneg %p605_p3  ;;  %p612_p7 = por %p611_p5, %p610_p11 }
  0x27   : > { %p613_p8 = pnand %p612_p7, %p606_p12 }
  0x29   : > { %616 = shalt.err (!%p613_p8)
}
  0x2a   : > { %s686_s29 = smov 128   ;;  %s687_s30 = smov 64  }
  0x2b   : > { %s688_s5 = smov 4   ;;  %p155_p9 = scmp.lt.s32.totalorder %s683_s15, 3 }
  0x2c   : > { %535 = dma.hbm_to_vmem [thread:$0]  (!%p780_p13), %s776_s4, 1024, %s784_s6, %s787_s8, %s686_s29, %s687_s30, %s688_s5  }
  0x2d   : > { %p966_p0 = scmp.ge.s32.totalorder %s683_s15, 1 }
  0x2f   : > { %p156_p2 = pnand %p966_p0, %p155_p9 }
  0x30   : > { %s819_s9 = sand.u32 (!%p156_p2), 1, %s675_s13  }
  0x31   : > { %159 = sbr.rel (%p156_p2) target bundleno = 476 (0x1dc), region = 32  ;;  %s452_s10 = sshll.u32 (!%p156_p2), %s819_s9, 6 }
  0x32   : > { %s162_s11 = scalar_lea.sflag (!%p156_p2), [#allocation3], %s819_s9  ;;  %s823_s17 = scalar_lea.vmem (!%p156_p2), [#allocation2], %s452_s10 }
  0x38   : > { %662 = dma.done.wait (%p756_p6), %s162_s11, 1024  }
  0x39   : > { %664 = vsyncadd (%p756_p6), %s162_s11, 4294966272  ;;  %v689_v0 = vmov 0.0   ;;  %v833_v1 = vld [vmem:[%s956_s0] sm:$0xff]  ;;  %v492_v3 = vld [vmem:[%s823_s17 + $0x8] sm:$0xff]   ;;  %vm690_vm0 = vmmov 0   ;;  %v691_v58 = vmov 0  }
  0x3a   : > { %508 = vmatprep.subr.bf16.mxu0 %v689_v0  ;;  %v461_v2 = vld [vmem:[%s823_s17] sm:$0xff]   ;;  %v223_v4 = vmul.f32 %v833_v1, %v833_v1  ;;  %v843_v7 = vunpack.c.l.bf16 %v492_v3  ;;  %v493_v8 = vld [vmem:[%s823_s17 + $0x10] sm:$0xff]   ;;  %v846_v9 = vunpack.c.h.bf16 %v492_v3  ;;  %v494_v14 = vld [vmem:[%s823_s17 + $0x18] sm:$0xff]   ;;  %524 = vmatprep.mubr.msk.bf16.mxu0 %vm690_vm0, %v689_v0  ;;  %s455_s8 = sshll.u32 %s734_s16, 7  ;;  %s453_s19 = sshll.u32 %s819_s9, 3 }
  0x3b   : > { %v839_v5 = vunpack.c.l.bf16 %v461_v2  ;;  %v841_v6 = vunpack.c.h.bf16 %v461_v2  ;;  %v852_v12 = vunpack.c.l.bf16 %v493_v8  ;;  %v857_v15 = vunpack.c.h.bf16 %v493_v8  ;;  %v495_v21 = vld [vmem:[%s823_s17 + $0x20] sm:$0xff]   ;;  %v496_v28 = vld [vmem:[%s823_s17 + $0x28] sm:$0xff]   ;;  %v497_v35 = vld [vmem:[%s823_s17 + $0x30] sm:$0xff]   ;;  %580 = vset.pattern.permute.xlu0 %v691_v58  ;;  %s187_s16 = scalar_lea.vmem [#allocation5], %s453_s19  ;;  %s912_s27 = scalar_lea.hbm %s959_s3, %s455_s8 }
  0x3c   : > { %224 = vadd.xlane.f32.xlu0 %v223_v4  ;;  %v231_v13 = vmul.f32 %v843_v7, %v843_v7  ;;  %v232_v16 = vmul.f32 %v846_v9, %v846_v9  ;;  %v861_v18 = vunpack.c.l.bf16 %v494_v14  ;;  %v866_v22 = vunpack.c.h.bf16 %v494_v14  ;;  %v498_v42 = vld [vmem:[%s823_s17 + $0x38] sm:$0xff]   ;;  %v222_v56 = vld [vmem:[%s958_s2] sm:$0xff]  ;;  %s376_s20 = sshll.u32 %s187_s16, 4  ;;  %s363_s28 = scalar_lea.sflag [#allocation4], %s819_s9  ;;  %s914_s20 = int_to_ptr.vmem [resolvable:$true] %s376_s20 }
  0x3d   : > { %v229_v10 = vmul.f32 %v839_v5, %v839_v5  ;;  %v230_v11 = vmul.f32 %v841_v6, %v841_v6  ;;  %v233_v19 = vmul.f32 %v852_v12, %v852_v12  ;;  %v234_v23 = vmul.f32 %v857_v15, %v857_v15  ;;  %s617_s29 = scalar_lea.vmem %s914_s20, 128  ;;  %p967_p11 = scmp.ne.s32.totalorder %s963_s24, 0 }
  0x3e   : > { %v870_v25 = vunpack.c.l.bf16 %v495_v21  ;;  %v235_v26 = vmul.f32 %v861_v18, %v861_v18  ;;  %v479_v29 = vunpack.c.h.bf16 %v495_v21  ;;  %v236_v30 = vmul.f32 %v866_v22, %v866_v22  ;;  %p618_p6 = scmp.ne.s32.totalorder %s914_s20, %s617_s29  ;;  %s692_s30 = smov [#allocation5]  }
  0x3f   : > { %v245_v17 = vadd.f32 %v230_v11, %v229_v10  ;;  %v877_v32 = vunpack.c.l.bf16 %v496_v28  ;;  %v483_v36 = vunpack.c.h.bf16 %v496_v28  ;;  %v486_v39 = vunpack.c.l.bf16 %v497_v35  ;;  %s621_s5 = sshll.u32 %s692_s30, 4  ;;  %s622_s5 = int_to_ptr.vmem [resolvable:$false] %s621_s5 }
  0x40   : > { %v237_v33 = vmul.f32 %v870_v25, %v870_v25  ;;  %v238_v37 = vmul.f32 %v479_v29, %v479_v29  ;;  %v487_v43 = vunpack.c.h.bf16 %v497_v35  ;;  %v490_v46 = vunpack.c.l.bf16 %v498_v42  ;;  %p619_p12 = pnand %p618_p6, %p967_p11  ;;  %s623_s10 = scalar_lea.vmem %s622_s5, 256 }
  0x41   : > { %v246_v20 = vadd.f32 %v245_v17, %v231_v13  ;;  %v239_v40 = vmul.f32 %v877_v32, %v877_v32  ;;  %v240_v44 = vmul.f32 %v483_v36, %v483_v36  ;;  %v241_v47 = vmul.f32 %v486_v39, %v486_v39  ;;  %p624_p4 = scmp.lt.s32.totalorder %s914_s20, %s622_s5  ;;  %p625_p10 = scmp.lt.s32.totalorder %s623_s10, %s617_s29 }
  0x42   : > { %v491_v49 = vunpack.c.h.bf16 %v498_v42  ;;  %v242_v50 = vmul.f32 %v487_v43, %v487_v43  ;;  %v243_v52 = vmul.f32 %v490_v46, %v490_v46  ;;  %p620_p13 = pneg %p619_p12 }
  0x43   : > { %v247_v24 = vadd.f32 %v246_v20, %v232_v16  ;;  %p626_p1 = por %p625_p10, %p624_p4 }
  0x44   : > { %v244_v54 = vmul.f32 %v491_v49, %v491_v49 }
  0x45   : > { %v248_v27 = vadd.f32 %v247_v24, %v233_v19  ;;  %p627_p3 = pnand %p626_p1, %p620_p13 }
  0x47   : > { %v249_v31 = vadd.f32 %v248_v27, %v234_v23 }
  0x49   : > { %v250_v34 = vadd.f32 %v249_v31, %v235_v26 }
  0x4b   : > { %v251_v38 = vadd.f32 %v250_v34, %v236_v30 }
  0x4d   : > { %v252_v41 = vadd.f32 %v251_v38, %v237_v33 }
  0x4f   : > { %v253_v45 = vadd.f32 %v252_v41, %v238_v37 }
  0x51   : > { %v254_v48 = vadd.f32 %v253_v45, %v239_v40  ;;  %v353_v45 = vstv %s455_s8 }
  0x52   : > { %356 = vperm.xlu0 %580, %v222_v56  }
  0x53   : > { %v255_v51 = vadd.f32 %v254_v48, %v240_v44 }
  0x55   : > { %v256_v53 = vadd.f32 %v255_v51, %v241_v47 }
  0x57   : > { %v257_v55 = vadd.f32 %v256_v53, %v242_v50 }
  0x59   : > { %v258_v57 = vadd.f32 %v257_v55, %v243_v52 }
  0x5b   : > { %v259_v59 = vadd.f32 %v258_v57, %v244_v54 }
  0x5d   : > { %v260_v60 = vrot.slane %v259_v59, 4 }
  0x5f   : > { %v261_v61 = vadd.f32 %v260_v60, %v259_v59 }
  0x61   : > { %v262_v62 = vrot.slane %v261_v61, 2 }
  0x63   : > { %v263_v63 = vadd.f32 %v262_v62, %v261_v61 }
  0x65   : > { %v264_v2 = vrot.slane %v263_v63, 1 }
  0x67   : > { %v265_v3 = vadd.f32 %v264_v2, %v263_v63 }
  0x69   : > { %v266_v4 = vmax.f32 %v265_v3, 1e-24 }
  0x6b   : > { %581 = vrsqrt.f32 %v266_v4 }
  0x75   : > { %v582_v8 = vpop.eup %581 }
  0x76   : > { %v268_v10 = vmul.f32 %v582_v8, %v839_v5  ;;  %v269_v11 = vmul.f32 %v582_v8, %v841_v6  ;;  %v270_v13 = vmul.f32 %v582_v8, %v843_v7  ;;  %v271_v14 = vmul.f32 %v582_v8, %v846_v9 }
  0x77   : > { %v272_v19 = vmul.f32 %v582_v8, %v852_v12  ;;  %v273_v20 = vmul.f32 %v582_v8, %v857_v15  ;;  %v274_v23 = vmul.f32 %v582_v8, %v861_v18  ;;  %v275_v5 = vmul.f32 %v582_v8, %v866_v22 }
  0x78   : > { %v285_v16 = vpack.c.bf16 %v269_v11, %v268_v10  ;;  %v286_v17 = vpack.c.bf16 %v271_v14, %v270_v13  ;;  %v276_v7 = vmul.f32 %v582_v8, %v870_v25  ;;  %v277_v9 = vmul.f32 %v582_v8, %v479_v29 }
  0x79   : > { %v287_v21 = vpack.c.bf16 %v273_v20, %v272_v19  ;;  %v288_v6 = vpack.c.bf16 %v275_v5, %v274_v23  ;;  %v278_v15 = vmul.f32 %v582_v8, %v877_v32  ;;  %v279_v24 = vmul.f32 %v582_v8, %v483_v36 }
  0x7a   : > { %509 = vmatpush3.bf16.msra.mxu0 %v285_v16  ;;  %v289_v12 = vpack.c.bf16 %v277_v9, %v276_v7  ;;  %v280_v26 = vmul.f32 %v582_v8, %v486_v39  ;;  %v281_v22 = vmul.f32 %v582_v8, %v487_v43  ;;  %v282_v28 = vmul.f32 %v582_v8, %v490_v46 }
  0x7b   : > { %510 = vmatprep.subr.bf16.mxu0 %v689_v0  ;;  %v290_v18 = vpack.c.bf16 %v279_v24, %v278_v15  ;;  %v283_v25 = vmul.f32 %v582_v8, %v491_v49 }
  0x7c   : > { %v291_v27 = vpack.c.bf16 %v281_v22, %v280_v26 }
  0x7d   : > { %v292_v29 = vpack.c.bf16 %v283_v25, %v282_v28 }
  0x7e   : > { %511 = vmatpush3.bf16.msra.mxu0 %v286_v17 }
  0x7f   : > { %512 = vmatprep.subr.bf16.mxu0 %v689_v0 }
  0x82   : > { %513 = vmatpush3.bf16.msra.mxu0 %v287_v21 }
  0x83   : > { %514 = vmatprep.subr.bf16.mxu0 %v689_v0 }
  0x86   : > { %515 = vmatpush3.bf16.msra.mxu0 %v288_v6 }
  0x87   : > { %516 = vmatprep.subr.bf16.mxu0 %v689_v0 }
  0x8a   : > { %517 = vmatpush3.bf16.msra.mxu0 %v289_v12 }
  0x8b   : > { %518 = vmatprep.subr.bf16.mxu0 %v689_v0 }
  0x8e   : > { %519 = vmatpush3.bf16.msra.mxu0 %v290_v18 }
  0x8f   : > { %520 = vmatprep.subr.bf16.mxu0 %v689_v0 }
  0x92   : > { %521 = vmatpush3.bf16.msra.mxu0 %v291_v27 }
  0x93   : > { %522 = vmatprep.subr.bf16.mxu0 %v689_v0  ;;  %v351_v0 = vlaneseq }
  0x95   : > { %v352_v43 = vand.u32 127, %v351_v0 }
  0x96   : > { %523 = vmatpush3.bf16.msra.mxu0 %v292_v29 }
  0x97   : > { %v354_v48 = vadd.s32 %v353_v45, %v352_v43 }
  0xc9   : > { %v225_v30 = vpop.xlane.xlu0 %224 }
  0xca   : > { %v226_v31 = vmax.f32 %v225_v30, 1e-24 }
  0xcc   : > { %583 = vrsqrt.f32 %v226_v31 }
  0xd1   : > { %v357_v50 = vpop.permute.xlu0 %356 }
  0xd2   : > { %vm358_vm3 = vcmp.eq.s32.totalorder %v354_v48, %v357_v50 }
  0xd6   : > { %v584_v32 = vpop.eup %583 }
  0xd7   : > { %v228_v33 = vmul.f32 %v584_v32, %v833_v1 }
  0xd9   : > { %v284_v34 = vpack.c.bf16 %v228_v33, %v228_v33 }
  0xdb   : > { %525 = vmatmul.mubr.bf16.vlgmr.msra.gmra.mrb[0].mxu0 %v284_v34 }
 0x1ae   : > { %v327_v35 = vpop.f32.mrb[0].mxu0 }
 0x1af   : > { %v333_v36 = vmul.f32 %v327_v35, %v327_v35  ;;  %v526_v37 = vpop.f32.mrb[1].mxu0  ;;  %v344_v51 = vmul.f32 0.87758255, %v327_v35  ;;  %v454_v53 = vadd.f32 -0.23971277, %v327_v35 }
 0x1b0   : > { %v330_v38 = vpop.f32.mrb[2].mxu0  ;;  %vm347_vm4 = vcmp.gt.f32.partialorder %v327_v35, -0.87758255 }
 0x1b1   : > { %v334_v39 = vsub.f32 1.0, %v333_v36  ;;  %v527_v40 = vpop.f32.mrb[3].mxu0 }
 0x1b3   : > { %v335_v41 = vmax.f32 %v334_v39, 0.0 }
 0x1b5   : > { %v336_v42 = vmin.f32 %v335_v41, 1.0 }
 0x1b7   : > { %585 = vrsqrt.f32 %v336_v42  ;;  %vm339_vm1 = vcmp.eq.f32.partialorder %v336_v42, inf  ;;  %v342_v1 = vand.u32 2147483648, %v336_v42  ;;  %vm341_vm2 = vcmp.eq.f32.partialorder %v336_v42, 0.0 }
 0x1c1   : > { %v586_v44 = vpop.eup %585 }
 0x1c2   : > { %v338_v46 = vmul.f32 %v586_v44, %v336_v42 }
 0x1c4   : > { %v340_v47 = vsel %vm339_vm1, %v336_v42, %v338_v46 }
 0x1c5   : > { %v343_v49 = vsel %vm341_vm2, %v342_v1, %v340_v47 }
 0x1c6   : > { %v345_v52 = vmul.f32 0.47942555, %v343_v49 }
 0x1c8   : > { %v346_v54 = vsub.f32 %v344_v51, %v345_v52 }
 0x1ca   : > { %v349_v55 = vsel %vm347_vm4, %v346_v54, %v454_v53 }
 0x1cb   : > { %v359_v56 = vsel %vm358_vm3, %v349_v55, %v327_v35 }
 0x1cc   : > { %v360_v57 = vmul.f32 30.0, %v359_v56 }
 0x1ce   : > { %361 = vst [vmem:[%s187_s16] sm:$0xff] %v360_v57 }
 0x1cf   : > { %630 = shalt.err (!%p627_p3)
}
 0x1d0   : > { %s631_s9 = scalar_lea.hbm %s912_s27, 128  ;;  %s635_s4 = scalar_lea.hbm %s959_s3, 256 }
 0x1d1   : > { %p632_p5 = scmp.ne.s32.totalorder %s912_s27, %s631_s9  ;;  %p636_p9 = scmp.lt.u32.totalorder %s912_s27, %s959_s3 }
 0x1d2   : > { %p637_p0 = scmp.lt.u32.totalorder %s635_s4, %s631_s9  ;;  %p639_p6 = scmp.lt.u32.totalorder %s631_s9, %s912_s27 }
 0x1d3   : > { %p633_p7 = pnand %p632_p5, %p967_p11 }
 0x1d4   : > { %p638_p2 = por %p637_p0, %p636_p9 }
 0x1d5   : > { %p634_p8 = pneg %p633_p7 }
 0x1d6   : > { %p640_p12 = por %p639_p6, %p638_p2 }
 0x1d8   : > { %p641_p13 = pnand %p640_p12, %p634_p8 }
 0x1da   : > { %644 = shalt.err (!%p641_p13)
}
 0x1db   : > { %530 = dma.vmem_to_hbm [thread:$0]  (%p967_p11), %s914_s20, 128, %s912_s27, %s363_s28  }
 0x1dc PF: > { %s388_s7 = sand.u32 1, %s671_s12   ;;  %p968_p4 = scmp.ne.s32.totalorder %s964_s25, 0 }
 0x1dd   : > { %p969_p10 = scmp.ge.s32.totalorder %s683_s15, 2  ;;  %s389_s8 = scalar_lea.sflag [#allocation4], %s388_s7 }
 0x1df   : > { %p537_p1 = pnand %p969_p10, %p968_p4 }
 0x1e1   : > { %666 = dma.done.wait (!%p537_p1), %s389_s8, 128  }
 0x1e2   : > { %668 = vsyncadd (!%p537_p1), %s389_s8, 4294967168  ;;  %p16_p3 = scmp.ge.s32.totalorder %s738_s18, 4   ;;  %s970_s12 = smov %s675_s13 }
 0x1e3   : > { %s971_s13 = smov %s679_s14  ;;  %s972_s14 = smov %s750_s21 }
 0x1e4   : > { %s973_s15 = smov %s738_s18  ;;  %18 = sbr.rel (!%p16_p3) target bundleno = 5 (0x5), region = 77 }
 0x1eb   :  { %394 = vsyncpa [#allocation3], 1 }
 0x1ec   :  { %396 = vsyncpa [#allocation3 + $0x1], 1 }
 0x1ed   :  { %397 = vsyncpa [#allocation4], 1 }
 0x1ee   :  { %399 = vsyncpa [#allocation4 + $0x1], 1 }

</bundles_post_ra>
